<compile_context>
chip_gen: v6e
topology: v6e:2x2x1
jax: 0.10.0
libtpu: 0.0.40
codegen_flags: <defaults>
</compile_context>

<pallas_src>
import numpy as np
import jax
import jax.numpy as jnp
from jax.experimental import pallas as pl
from jax.experimental.pallas import tpu as pltpu


_NEG = -1e30  # finite "minus infinity" (avoids 0 * inf / exp-overflow NaNs)


def _round_up(x, m):
    return ((x + m - 1) // m) * m


def _vmem_budget_bytes():
    """Per-core VMEM budget: ~75% of capacity (≈48 MiB v7x, ≈96 MiB v5e/v6e)."""
    try:
        cap = int(pltpu.get_tpu_info().vmem_capacity_bytes)
    except Exception:
        cap = 64 * 1024 * 1024  # assume the smallest generation if the query fails
    return (cap * 3) // 4


def _auto_tile_n(N, Dp, Bp, itemsize, budget):
    """Pick a big bank tile (amortize ~0.35us/step) that keeps 2x double-buffered
    bank tiles plus the (Bp, tn) f32 logits temporaries inside the VMEM budget."""
    per_buf = min(max(budget // 5, 2 * 1024 * 1024), 24 * 1024 * 1024)
    tn = per_buf // (Dp * itemsize)
    tn = min(tn, max(per_buf // (Bp * 4), 512))   # bound f32 logits/exp temporaries
    tn = min(tn, 32768)
    tn = max(128, (tn // 128) * 128)
    tn = min(tn, _round_up(N, 128))
    return int(tn)


def _wm_partial_kernel(x_ref, w_ref, aux_ref, m_ref, l_ref, ws_ref):
    """One (split c, bank-tile n) step of the streamed online-logsumexp.

    Outputs (per split): running max m, running exp-sum l, weighted-logit sum ws.
    They are accumulated directly in the resident output blocks (same block index
    for every n within a split) and combined across splits in the wrapper.
    """
    n = pl.program_id(1)

    @pl.when(n == 0)
    def _init():
        m_ref[...] = jnp.full_like(m_ref, _NEG)
        l_ref[...] = jnp.zeros_like(l_ref)
        ws_ref[...] = jnp.zeros_like(ws_ref)

    # logits tile = (xn / temp) @ features_tile.T ; contract last dims (no transpose),
    # bf16 x bf16 -> f32 on the MXU.
    logits = jax.lax.dot_general(
        x_ref[...], w_ref[...],
        dimension_numbers=(((1,), (1,)), ((), ())),
        preferred_element_type=jnp.float32)                      # (Bp, tn) f32

    aux = aux_ref[...]                                           # (2, tn) f32
    s = aux[0:1, :]                                              # scores (0 on pads)
    bias = aux[1:2, :]                                           # 0 / -1e30 pad bias

    # sum_t score[t] * logits[b, t]   (padded slots have score 0 -> contribute 0)
    ws_ref[0] += jnp.sum(logits * s, axis=1, keepdims=True)

    # Online logsumexp over the true memory slots (pad columns pushed to -1e30;
    # any spurious all-pad contribution is annihilated by exp(-1e30 - m) == 0).
    masked = logits + bias
    m_prev = m_ref[0]                                            # (Bp, 1)
    m_new = jnp.maximum(m_prev, jnp.max(masked, axis=1, keepdims=True))
    l_ref[0] = jnp.exp(m_prev - m_new) * l_ref[0] + jnp.sum(
        jnp.exp(masked - m_new), axis=1, keepdims=True)
    m_ref[0] = m_new


def wireless_memory_loss(inputs, scores, features, temp=0.05, *,
                         bank_dtype=jnp.bfloat16, tn=None, eps=1e-12):
    """inputs: (B, D), scores: (N,), features: (N, D)  ->  scalar f32 loss."""
    B, D = inputs.shape
    N, D2 = features.shape
    assert D == D2 and scores.shape == (N,)

    Dp = _round_up(D, 128)
    Bp = _round_up(B, 16)              # bf16 query tile is (16, 128)
    itemsize = jnp.dtype(bank_dtype).itemsize
    budget = _vmem_budget_bytes()

    if tn is None:
        tn = _auto_tile_n(N, Dp, Bp, itemsize, budget)
    tn = int(min(_round_up(int(tn), 128), _round_up(N, 128)))

    total_tiles = _round_up(N, tn) // tn
    # Two splits feed the two v7x TensorCores via the leading "parallel" axis; on
    # single-core chips (v5e/v6e) the extra split just runs serially (negligible).
    num_splits = 2 if total_tiles >= 2 else 1
    tiles_per_split = -(-total_tiles // num_splits)
    Np = num_splits * tiles_per_split * tn
    # Invariant: split 0 always covers column 0 (a real slot), so the combined
    # logsumexp is always finite; fully padded tiles/splits contribute exactly 0.

    # Query preprocessing hoisted out of the kernel: F.normalize(inputs, dim=1)
    # with 1/temp folded in (rsqrt+mul), cast once to the MXU input dtype.
    inv_temp = 1.0 / temp
    x = inputs.astype(jnp.float32)
    scale = inv_temp * jax.lax.rsqrt(
        jnp.maximum(jnp.sum(x * x, axis=1, keepdims=True), eps * eps))
    x_p = jnp.zeros((Bp, Dp), bank_dtype).at[:B, :D].set((x * scale).astype(bank_dtype))

    w_p = jnp.zeros((Np, Dp), bank_dtype).at[:N, :D].set(features.astype(bank_dtype))

    col = jnp.arange(Np)
    aux_p = jnp.stack([
        jnp.zeros((Np,), jnp.float32).at[:N].set(scores.astype(jnp.float32)),
        jnp.where(col < N, 0.0, _NEG).astype(jnp.float32),
    ], axis=0)                                                   # (2, Np)

    out_shape = tuple(jax.ShapeDtypeStruct((num_splits, Bp, 1), jnp.float32)
                      for _ in range(3))
    stat_spec = pl.BlockSpec((1, Bp, 1), lambda c, n: (c, 0, 0))

    m_p, l_p, ws_p = pl.pallas_call(
        _wm_partial_kernel,
        out_shape=out_shape,
        grid_spec=pltpu.PrefetchScalarGridSpec(
            num_scalar_prefetch=0,
            grid=(num_splits, tiles_per_split),
            in_specs=[
                pl.BlockSpec((Bp, Dp), lambda c, n: (0, 0)),        # queries (resident)
                pl.BlockSpec((tn, Dp),                              # streamed bank tile
                             lambda c, n: (c * tiles_per_split + n, 0)),
                pl.BlockSpec((2, tn),                               # scores + pad bias
                             lambda c, n: (0, c * tiles_per_split + n)),
            ],
            out_specs=[stat_spec, stat_spec, stat_spec],
        ),
        compiler_params=pltpu.CompilerParams(
            dimension_semantics=("parallel", "arbitrary"),
            vmem_limit_bytes=int(budget),
        ),
    )(x_p, w_p, aux_p)

    # Cross-split combine of the online-softmax partials (tiny, O(num_splits * B)).
    m = jnp.max(m_p, axis=0)                                     # (Bp, 1)
    l = jnp.sum(jnp.exp(m_p - m) * l_p, axis=0)                  # (Bp, 1)
    ws = jnp.sum(ws_p, axis=0)                                   # (Bp, 1)
    lse = (m + jnp.log(l))[:B, 0]                                # real batch rows only
    sum_s = jnp.sum(scores.astype(jnp.float32))
    # loss = sum(score) * mean_b(lse_b) - mean_b(sum_t score[t] * logits[b, t])
    return jnp.mean(sum_s * lse - ws[:B, 0])


def reference_loss(inputs, scores, features, temp=0.05, eps=1e-12):
    """Pure-JAX reference of the PyTorch loop; precision follows `features.dtype`."""
    x = inputs.astype(jnp.float32)
    xn = x * ((1.0 / temp) * jax.lax.rsqrt(
        jnp.maximum(jnp.sum(x * x, axis=1, keepdims=True), eps * eps)))
    logits = jax.lax.dot_general(
        xn.astype(features.dtype), features,
        dimension_numbers=(((1,), (1,)), ((), ())),
        preferred_element_type=jnp.float32)
    lse = jax.scipy.special.logsumexp(logits, axis=1)
    s = scores.astype(jnp.float32)
    # sum_t s[t] * mean_b(lse_b - logits[b, t])
    return jnp.sum(s) * jnp.mean(lse) - jnp.mean(logits @ s)


if __name__ == "__main__":
    key = jax.random.PRNGKey(0)
    k1, k2, k3 = jax.random.split(key, 3)

    B, D, N = 8, 32, 300          # batch, num_features, num_samples (memory slots)
    temp = 0.05

    inputs = jax.random.normal(k1, (B, D), dtype=jnp.float32)
    # Module buffer init is zeros; use normalized random rows so the loss is
    # non-degenerate (as it would be after a few memory updates).
    features = jax.random.normal(k2, (N, D), dtype=jnp.float32)
    features = features / jnp.linalg.norm(features, axis=1, keepdims=True)
    # `targets` in the module: one score per memory slot, some exactly zero.
    scores = jax.random.uniform(k3, (N,), dtype=jnp.float32)
    scores = jnp.where(scores > 0.3, scores, 0.0)

    # tn=128 forces a 3-tile, 2-split grid at this toy size to exercise the online
    # accumulation, the partially/fully padded tiles, and the cross-split combine.
    loss_tiled = wireless_memory_loss(inputs, scores, features, temp=temp, tn=128)
    # auto tn exercises the single-tile / single-split fast path.
    loss_auto = wireless_memory_loss(inputs, scores, features, temp=temp)
    loss_tiled, loss_auto = jax.block_until_ready((loss_tiled, loss_auto))

    # Reference mirroring the kernel's precision policy (bf16 bank, f32 accum).
    ref_bf16 = reference_loss(inputs, scores, features.astype(jnp.bfloat16), temp=temp)
    # Full-f32 reference (original module semantics) — looser tolerance (bf16 bank).
    ref_f32 = reference_loss(inputs, scores, features, temp=temp)

    for val in (loss_tiled, loss_auto):
        assert np.allclose(np.asarray(val), np.asarray(ref_bf16), rtol=1e-3, atol=1e-3), (
            float(val), float(ref_bf16))
        assert np.allclose(np.asarray(val), np.asarray(ref_f32), rtol=3e-2, atol=3e-2), (
            float(val), float(ref_f32))
    print("KERNEL_OK")
</pallas_src>

<mosaic_0001>
module attributes {stable_mosaic.version = 11 : i64} {
  func.func @_wm_partial_kernel(%arg0: i32, %arg1: i32, %arg2: memref<16x128xbf16, #tpu.memory_space<vmem>>, %arg3: memref<128x128xbf16, #tpu.memory_space<vmem>>, %arg4: memref<2x128xf32, #tpu.memory_space<vmem>>, %arg5: memref<1x16x1xf32, #tpu.memory_space<vmem>>, %arg6: memref<1x16x1xf32, #tpu.memory_space<vmem>>, %arg7: memref<1x16x1xf32, #tpu.memory_space<vmem>>) attributes {dimension_semantics = [#tpu.dimension_semantics<parallel>, #tpu.dimension_semantics<arbitrary>], iteration_bounds = array<i64: 2, 2>, scalar_prefetch = 0 : i64, scratch_operands = 0 : i64, tpu.core_type = #tpu.core_type<tc>, window_params = [{pipeline_mode = #tpu.pipeline_mode<synchronous>, transform_indices = @transform_0, window_bounds = array<i64: 16, 128>}, {transform_indices = @transform_1, window_bounds = array<i64: 128, 128>}, {transform_indices = @transform_2, window_bounds = array<i64: 2, 128>}, {transform_indices = @transform_3, window_bounds = array<i64: 1, 16, 1>}, {transform_indices = @transform_4, window_bounds = array<i64: 1, 16, 1>}, {transform_indices = @transform_5, window_bounds = array<i64: 1, 16, 1>}]} {
    %c0_i32 = arith.constant 0 : i32
    %0 = arith.cmpi eq, %arg1, %c0_i32 : i32
    %1 = arith.extui %0 : i1 to i32
    %c0_i32_0 = arith.constant 0 : i32
    %2 = arith.cmpi ne, %1, %c0_i32_0 : i32
    scf.if %2 {
      %cst_27 = arith.constant -1.000000e+30 : f32
      %43 = vector.broadcast %cst_27 : f32 to vector<1x16x1xf32>
      %c0_28 = arith.constant 0 : index
      %c0_29 = arith.constant 0 : index
      %c0_30 = arith.constant 0 : index
      %44 = vector.load %arg5[%c0_28, %c0_29, %c0_30] : memref<1x16x1xf32, #tpu.memory_space<vmem>>, vector<1x16x1xf32>
      tpu.vector_store %arg5[%c0_28, %c0_29, %c0_30], %43 {strides = array<i32>} : memref<1x16x1xf32, #tpu.memory_space<vmem>>, vector<1x16x1xf32>,
      %cst_31 = arith.constant 0.000000e+00 : f32
      %45 = vector.broadcast %cst_31 : f32 to vector<1x16x1xf32>
      %c0_32 = arith.constant 0 : index
      %c0_33 = arith.constant 0 : index
      %c0_34 = arith.constant 0 : index
      %46 = vector.load %arg6[%c0_32, %c0_33, %c0_34] : memref<1x16x1xf32, #tpu.memory_space<vmem>>, vector<1x16x1xf32>
      tpu.vector_store %arg6[%c0_32, %c0_33, %c0_34], %45 {strides = array<i32>} : memref<1x16x1xf32, #tpu.memory_space<vmem>>, vector<1x16x1xf32>,
      %cst_35 = arith.constant 0.000000e+00 : f32
      %47 = vector.broadcast %cst_35 : f32 to vector<1x16x1xf32>
      %c0_36 = arith.constant 0 : index
      %c0_37 = arith.constant 0 : index
      %c0_38 = arith.constant 0 : index
      %48 = vector.load %arg7[%c0_36, %c0_37, %c0_38] : memref<1x16x1xf32, #tpu.memory_space<vmem>>, vector<1x16x1xf32>
      tpu.vector_store %arg7[%c0_36, %c0_37, %c0_38], %47 {strides = array<i32>} : memref<1x16x1xf32, #tpu.memory_space<vmem>>, vector<1x16x1xf32>,
    } else {
    }
    %c0 = arith.constant 0 : index
    %c0_1 = arith.constant 0 : index
    %3 = vector.load %arg2[%c0, %c0_1] : memref<16x128xbf16, #tpu.memory_space<vmem>>, vector<16x128xbf16>
    %c0_2 = arith.constant 0 : index
    %c0_3 = arith.constant 0 : index
    %4 = vector.load %arg3[%c0_2, %c0_3] : memref<128x128xbf16, #tpu.memory_space<vmem>>, vector<128x128xbf16>
    %cst = arith.constant dense<0.000000e+00> : vector<16x128xf32>
    %5 = tpu.matmul %3, %4, %cst {dimension_numbers = #tpu.dot_dimension_numbers<[1], [1], [0], [0], [0, 0, 1, 0], [], []>} : vector<16x128xbf16>, vector<128x128xbf16>, vector<16x128xf32> -> vector<16x128xf32>
    %c0_4 = arith.constant 0 : index
    %c0_5 = arith.constant 0 : index
    %6 = vector.load %arg4[%c0_4, %c0_5] : memref<2x128xf32, #tpu.memory_space<vmem>>, vector<2x128xf32>
    %7 = vector.extract_strided_slice %6 {offsets = [0, 0], sizes = [1, 128], strides = [1, 1]} : vector<2x128xf32> to vector<1x128xf32>
    %8 = vector.extract_strided_slice %6 {offsets = [1, 0], sizes = [1, 128], strides = [1, 1]} : vector<2x128xf32> to vector<1x128xf32>
    %c0_6 = arith.constant 0 : index
    %c0_7 = arith.constant 0 : index
    %c0_8 = arith.constant 0 : index
    %9 = vector.load %arg7[%c0_6, %c0_7, %c0_8] : memref<1x16x1xf32, #tpu.memory_space<vmem>>, vector<1x16x1xf32>
    %10 = vector.shape_cast %9 : vector<1x16x1xf32> to vector<16x1xf32>
    %11 = vector.broadcast %7 : vector<1x128xf32> to vector<16x128xf32>
    %12 = arith.mulf %5, %11 : vector<16x128xf32>
    %cst_9 = arith.constant dense<0.000000e+00> : vector<16xf32>
    %13 = vector.multi_reduction <add>, %12, %cst_9 [1] : vector<16x128xf32> to vector<16xf32>
    %14 = vector.shape_cast %13 : vector<16xf32> to vector<16x1xf32>
    %15 = arith.addf %10, %14 : vector<16x1xf32>
    %c0_10 = arith.constant 0 : index
    %c0_11 = arith.constant 0 : index
    %c0_12 = arith.constant 0 : index
    %16 = vector.load %arg7[%c0_10, %c0_11, %c0_12] : memref<1x16x1xf32, #tpu.memory_space<vmem>>, vector<1x16x1xf32>
    %17 = vector.shape_cast %16 : vector<1x16x1xf32> to vector<16x1xf32>
    %18 = vector.shape_cast %15 : vector<16x1xf32> to vector<1x16x1xf32>
    tpu.vector_store %arg7[%c0_10, %c0_11, %c0_12], %18 {strides = array<i32>} : memref<1x16x1xf32, #tpu.memory_space<vmem>>, vector<1x16x1xf32>,
    %19 = vector.broadcast %8 : vector<1x128xf32> to vector<16x128xf32>
    %20 = arith.addf %5, %19 : vector<16x128xf32>
    %c0_13 = arith.constant 0 : index
    %c0_14 = arith.constant 0 : index
    %c0_15 = arith.constant 0 : index
    %21 = vector.load %arg5[%c0_13, %c0_14, %c0_15] : memref<1x16x1xf32, #tpu.memory_space<vmem>>, vector<1x16x1xf32>
    %22 = vector.shape_cast %21 : vector<1x16x1xf32> to vector<16x1xf32>
    %cst_16 = arith.constant dense<0xFF800000> : vector<16xf32>
    %23 = vector.multi_reduction <maximumf>, %20, %cst_16 [1] : vector<16x128xf32> to vector<16xf32>
    %24 = vector.shape_cast %23 : vector<16xf32> to vector<16x1xf32>
    %25 = arith.maximumf %22, %24 : vector<16x1xf32>
    %26 = arith.subf %22, %25 : vector<16x1xf32>
    %27 = math.exp %26 : vector<16x1xf32>
    %c0_17 = arith.constant 0 : index
    %c0_18 = arith.constant 0 : index
    %c0_19 = arith.constant 0 : index
    %28 = vector.load %arg6[%c0_17, %c0_18, %c0_19] : memref<1x16x1xf32, #tpu.memory_space<vmem>>, vector<1x16x1xf32>
    %29 = vector.shape_cast %28 : vector<1x16x1xf32> to vector<16x1xf32>
    %30 = arith.mulf %27, %29 : vector<16x1xf32>
    %31 = vector.broadcast %25 : vector<16x1xf32> to vector<16x128xf32>
    %32 = arith.subf %20, %31 : vector<16x128xf32>
    %33 = math.exp %32 : vector<16x128xf32>
    %cst_20 = arith.constant dense<0.000000e+00> : vector<16xf32>
    %34 = vector.multi_reduction <add>, %33, %cst_20 [1] : vector<16x128xf32> to vector<16xf32>
    %35 = vector.shape_cast %34 : vector<16xf32> to vector<16x1xf32>
    %36 = arith.addf %30, %35 : vector<16x1xf32>
    %c0_21 = arith.constant 0 : index
    %c0_22 = arith.constant 0 : index
    %c0_23 = arith.constant 0 : index
    %37 = vector.load %arg6[%c0_21, %c0_22, %c0_23] : memref<1x16x1xf32, #tpu.memory_space<vmem>>, vector<1x16x1xf32>
    %38 = vector.shape_cast %37 : vector<1x16x1xf32> to vector<16x1xf32>
    %39 = vector.shape_cast %36 : vector<16x1xf32> to vector<1x16x1xf32>
    tpu.vector_store %arg6[%c0_21, %c0_22, %c0_23], %39 {strides = array<i32>} : memref<1x16x1xf32, #tpu.memory_space<vmem>>, vector<1x16x1xf32>,
    %c0_24 = arith.constant 0 : index
    %c0_25 = arith.constant 0 : index
    %c0_26 = arith.constant 0 : index
    %40 = vector.load %arg5[%c0_24, %c0_25, %c0_26] : memref<1x16x1xf32, #tpu.memory_space<vmem>>, vector<1x16x1xf32>
    %41 = vector.shape_cast %40 : vector<1x16x1xf32> to vector<16x1xf32>
    %42 = vector.shape_cast %25 : vector<16x1xf32> to vector<1x16x1xf32>
    tpu.vector_store %arg5[%c0_24, %c0_25, %c0_26], %42 {strides = array<i32>} : memref<1x16x1xf32, #tpu.memory_space<vmem>>, vector<1x16x1xf32>,
    return
  }
  func.func @transform_0(%arg0: i32, %arg1: i32) -> (i32, i32) {
    %c0_i32 = arith.constant 0 : i32
    %c0_i32_0 = arith.constant 0 : i32
    %c0_i32_1 = arith.constant 0 : i32
    return %c0_i32, %c0_i32_0 : i32, i32
  }
  func.func @transform_1(%arg0: i32, %arg1: i32) -> (i32, i32) {
    %c2_i32 = arith.constant 2 : i32
    %0 = arith.muli %arg0, %c2_i32 : i32
    %1 = arith.addi %0, %arg1 : i32
    %c0_i32 = arith.constant 0 : i32
    %c0_i32_0 = arith.constant 0 : i32
    return %1, %c0_i32 : i32, i32
  }
  func.func @transform_2(%arg0: i32, %arg1: i32) -> (i32, i32) {
    %c2_i32 = arith.constant 2 : i32
    %0 = arith.muli %arg0, %c2_i32 : i32
    %1 = arith.addi %0, %arg1 : i32
    %c0_i32 = arith.constant 0 : i32
    %c0_i32_0 = arith.constant 0 : i32
    return %c0_i32, %1 : i32, i32
  }
  func.func @transform_3(%arg0: i32, %arg1: i32) -> (i32, i32, i32) {
    %c0_i32 = arith.constant 0 : i32
    %c0_i32_0 = arith.constant 0 : i32
    %c0_i32_1 = arith.constant 0 : i32
    return %arg0, %c0_i32, %c0_i32_0 : i32, i32, i32
  }
  func.func @transform_4(%arg0: i32, %arg1: i32) -> (i32, i32, i32) {
    %c0_i32 = arith.constant 0 : i32
    %c0_i32_0 = arith.constant 0 : i32
    %c0_i32_1 = arith.constant 0 : i32
    return %arg0, %c0_i32, %c0_i32_0 : i32, i32, i32
  }
  func.func @transform_5(%arg0: i32, %arg1: i32) -> (i32, i32, i32) {
    %c0_i32 = arith.constant 0 : i32
    %c0_i32_0 = arith.constant 0 : i32
    %c0_i32_1 = arith.constant 0 : i32
    return %arg0, %c0_i32, %c0_i32_0 : i32, i32, i32
  }
}

</mosaic_0001>

<bundles_post_ra>
// kernel: tpu_custom_call.1
= control target key start
LH: loop header
LB: loop body
LE: loop exit
PB: predicated region body
PF: predicated region fallthrough
CT: control target
= control target key end

     0   :  { %11 = vsyncpa [#allocation3], 0  ;;  %s1342_s0 = inlined_call_operand.hbm [shape: bf16[16,128], index: 0, kind: input, shape index: {}]   ;;  %s1343_s1 = inlined_call_operand.hbm [shape: bf16[512,128], index: 1, kind: input, shape index: {}]   ;;  %s1344_s2 = inlined_call_operand.hbm [shape: f32[2,512], index: 2, kind: input, shape index: {}]   ;;  %s1345_s3 = inlined_call_operand.vmem [shape: f32[2,16,1], index: 3, kind: output, shape index: {0}]   ;;  %s1346_s4 = inlined_call_operand.vmem [shape: f32[2,16,1], index: 4, kind: output, shape index: {1}]   ;;  %s1347_s5 = inlined_call_operand.vmem [shape: f32[2,16,1], index: 5, kind: output, shape index: {2}]  }
   0x1   :  { %12 = vsyncpa [#allocation5], 0 }
   0x2   :  { %14 = vsyncpa [#allocation5 + $0x1], 0  ;;  %s1099_s18 = smov 0   ;;  %s1101_s19 = smov 0  }
   0x3   :  { %s1103_s20 = smov 0   ;;  %s1105_s21 = smov 0  }
   0x4   :  { %s1107_s22 = smov 0   ;;  %s1109_s23 = smov 0  }
   0x5   :  { %s1111_s24 = smov 0   ;;  %s1113_s25 = smov 0  }
   0x6 LB: > { %1354 = sst [smem:[#allocation9_spill]] %s1053_s24  ;;  %s29_s26 = sadd.s32 1, %s1049_s23  ;;  %s1057_s25 = sphi %s1113_s25, %s20_s25   ;;  %s1053_s24 = sphi %s1111_s24, %s1367_s24   ;;  %s1049_s23 = sphi %s1109_s23, %s1372_s23   ;;  %s1045_s22 = sphi %s1107_s22, %s1366_s22   ;;  %s1041_s21 = sphi %s1105_s21, %s1371_s21   ;;  %s1037_s20 = sphi %s1103_s20, %s1370_s20   ;;  %s1033_s19 = sphi %s1101_s19, %s1369_s19   ;;  %s1029_s18 = sphi %s1099_s18, %s1368_s18  }
   0x7   : > { %s32_s27 = sadd.s32 1, %s1053_s24  ;;  %p30_p0 = scmp.ge.s32.totalorder %s29_s26, 2 }
   0x8   : > { %s723_s28 = sshll.u32 %s1053_s24, 1  ;;  %s64_s30 = sadd.s32 1, %s1037_s20 }
   0x9   : > { %s1143_s29 = sadd.s32 %s1049_s23, %s723_s28  ;;  %s1374_s26 = smov (%p30_p0, %s29_s26), 0 }
   0xa   : > { %s1376_s27 = smov (!%p30_p0, %s32_s27), %s1053_s24  ;;  %p71_p1 = scmp.ne.s32.totalorder %s1037_s20, %s1033_s19 }
   0xb   : > { %p72_p2 = scmp.eq.s32.totalorder %s1057_s25, 0  ;;  %p34_p3 = scmp.ge.s32.totalorder %s1376_s27, 2 }
   0xc   : > { %p812_p5 = scmp.lt.s32.totalorder %s1057_s25, 4  ;;  %s222_s8 = sand.u32 1, %s1057_s25  }
   0xd   : > { %p1152_p4 = por %p72_p2, %p71_p1  ;;  %s1378_s27 = smov (%p34_p3, %s1376_s27), 0 }
   0xe   : > { %1356 = sst [smem:[#allocation10_spill]] %s1378_s27  ;;  %s724_s7 = sshll.u32 %s1378_s27, 1 }
   0xf   : > { %s60_s9 = sadd.s32 %s724_s7, %s1374_s26  ;;  %s224_s11 = sand.u32 1, %s1037_s20  }
  0x10   : > { %s61_s10 = ssub.s32 %s1143_s29, %s60_s9  ;;  %s730_s12 = sshll.u32 %s224_s11, 6 }
  0x11   : > { %p62_p6 = scmp.eq.s32.totalorder %s61_s10, 0  ;;  %s759_s13 = sshll.u32 %s1143_s29, 10 }
  0x12   : > { %s234_s17 = scalar_lea.hbm %s1343_s1, %s759_s13  ;;  %s226_s28 = scalar_lea.vmem [#allocation4], %s730_s12 }
  0x13   : > { %s1168_s14 = scalar_select %p62_p6, %s1037_s20, %s64_s30  }
  0x14   : > { %s235_s24 = sshll.u32 %s226_s28, 4  ;;  %p1177_p7 = pnand %p812_p5, %p1152_p4  ;;  %s236_s24 = int_to_ptr.vmem [resolvable:$true] %s235_s24 }
  0x15   : > { %s1181_s7 = scalar_lea.sflag [#allocation5], %s222_s8  ;;  %s918_s30 = scalar_lea.vmem %s236_s24, 1024 }
  0x16   : > { %p1353_p8 = pneg %p1177_p7  ;;  %p919_p9 = scmp.ne.s32.totalorder %s236_s24, %s918_s30 }
  0x17   : > { %s1059_s9 = smov [#allocation4]  }
  0x18   : > { %p921_p10 = pnand %p919_p9, %p1353_p8  ;;  %s923_s10 = sshll.u32 %s1059_s9, 4  ;;  %s924_s10 = int_to_ptr.vmem [resolvable:$false] %s923_s10 }
  0x19   : > { %s925_s6 = scalar_lea.vmem %s924_s10, 2048  ;;  %p926_p12 = scmp.lt.s32.totalorder %s236_s24, %s924_s10 }
  0x1a   : > { %p922_p11 = pneg %p921_p10  ;;  %p927_p13 = scmp.lt.s32.totalorder %s925_s6, %s918_s30 }
  0x1c   : > { %p928_p0 = por %p927_p13, %p926_p12 }
  0x1e   : > { %p929_p1 = pnand %p928_p0, %p922_p11 }
  0x20   : > { %932 = shalt.err (!%p929_p1)
}
  0x21   : > { %s1351_s12 = smov 64   ;;  %s1352_s8 = smov 4  }
  0x22   : > { %807 = dma.hbm_to_vmem [thread:$0]  (!%p1177_p7), %s234_s17, 1024, %s236_s24, %s1181_s7, %s1351_s12, %s1351_s12, %s1352_s8  }
  0x23   : > { %s1350_s13 = sadd.s32 4294967295, %s1057_s25   ;;  %p77_p2 = scmp.ne.s32.totalorder %s1033_s19, %s1029_s18 }
  0x24   : > { %p1199_p3 = scmp.eq.s32.totalorder %s1350_s13, 0  ;;  %p727_p4 = scmp.ge.s32.totalorder %s1057_s25, 1 }
  0x25   : > { %p196_p5 = scmp.lt.s32.totalorder %s1057_s25, 5  ;;  %s1062_s18 = smov [#allocation2]  }
  0x26   : > { %p1207_p6 = por %p1199_p3, %p77_p2  ;;  %s208_s24 = sshll.u32 %s1062_s18, 4  ;;  %s209_s24 = int_to_ptr.vmem [resolvable:$true] %s208_s24 }
  0x27   : > { %p1211_p9 = pnand %p727_p4, %p196_p5  ;;  %s734_s17 = sshll.u32 %s224_s11, 1 }
  0x28   : > { %s736_s30 = sshll.u32 %s1143_s29, 5  ;;  %s249_s12 = scalar_lea.vmem [#allocation6], %s734_s17 }
  0x29   : > { %p800_p10 = pneg %p1211_p9  ;;  %s1229_s13 = scalar_lea.hbm %s1344_s2, %s736_s30 }
  0x2a   : > { %s258_s8 = sshll.u32 %s249_s12, 4  ;;  %s944_s11 = scalar_lea.vmem %s209_s24, 128  ;;  %s259_s8 = int_to_ptr.vmem [resolvable:$true] %s258_s8 }
  0x2b   : > { %p1222_p11 = pnand %p800_p10, %p1199_p3  ;;  %p945_p13 = scmp.ne.s32.totalorder %s209_s24, %s944_s11 }
  0x2c   : > { %p952_p2 = scmp.lt.s32.totalorder %s209_s24, %s209_s24  ;;  %p953_p4 = scmp.lt.s32.totalorder %s944_s11, %s944_s11 }
  0x2d   : > { %p935_p12 = pneg %p1222_p11 }
  0x2e   : > { %p954_p5 = por %p953_p4, %p952_p2 }
  0x2f   : > { %p947_p0 = pnand %p945_p13, %p935_p12 }
  0x31   : > { %p948_p1 = pneg %p947_p0 }
  0x33   : > { %p955_p10 = pnand %p954_p5, %p948_p1 }
  0x35   : > { %958 = shalt.err (!%p955_p10)
}
  0x36   : > { %s1362_s29 = smov 4   ;;  %s1363_s18 = smov 64  }
  0x37   : > { %803 = dma.hbm_to_vmem [thread:$0]  (!%p1222_p11), %s1342_s0, 128, %s209_s24, [#allocation3], %s1363_s18, %s1363_s18, %s1362_s29  }
  0x38   : > { %s972_s12 = scalar_lea.vmem %s259_s8, 32  ;;  %p1364_p12 = pneg %p1177_p7 }
  0x39   : > { %p973_p8 = scmp.ne.s32.totalorder %s259_s8, %s972_s12  ;;  %s1063_s10 = smov [#allocation6]  }
  0x3a   : > { %s977_s6 = sshll.u32 %s1063_s10, 4  ;;  %s978_s6 = int_to_ptr.vmem [resolvable:$false] %s977_s6 }
  0x3b   : > { %p975_p13 = pnand %p973_p8, %p1364_p12  ;;  %s979_s11 = scalar_lea.vmem %s978_s6, 64 }
  0x3c   : > { %p980_p1 = scmp.lt.s32.totalorder %s259_s8, %s978_s6  ;;  %p981_p2 = scmp.lt.s32.totalorder %s979_s11, %s972_s12 }
  0x3d   : > { %p976_p0 = pneg %p975_p13 }
  0x3e   : > { %p982_p4 = por %p981_p2, %p980_p1 }
  0x40   : > { %p983_p5 = pnand %p982_p4, %p976_p0 }
  0x42   : > { %986 = shalt.err (!%p983_p5)
}
  0x43   : > { %810 = dma.hbm_to_vmem [thread:$0]  (!%p1177_p7), %s1229_s13, 32, %s259_s8, %s1181_s7  }
  0x44   : > { %267 = sbr.rel (%p1211_p9) target bundleno = 777 (0x309), region = 32 }
  0x49   : > { %1020 = dma.done.wait (%p1199_p3), [#allocation3], 128  }
  0x4a   : > { %1022 = vsyncadd (%p1199_p3), [#allocation3], 4294967168  ;;  %s1365_s24 = sadd.s32 4294967295, %s1057_s25   ;;  %s275_s29 = sand.u32 1, %s1033_s19  }
  0x4b   : > { %s273_s9 = sand.u32 1, %s1365_s24   ;;  %s739_s18 = sshll.u32 %s275_s29, 6 }
  0x4c   : > { %s274_s27 = scalar_lea.sflag [#allocation5], %s273_s9  ;;  %s1257_s30 = scalar_lea.vmem [#allocation4], %s739_s18 }
  0x4d   : > { %1024 = dma.done.wait (%p1207_p6), %s274_s27, 1056  }
  0x4e   : > { %1026 = vsyncadd (%p1207_p6), %s274_s27, 4294966240  ;;  %s1263_s7 = sshll.u32 %s275_s29, 1  ;;  %p333_p7 = scmp.lt.s32.totalorder %s1045_s22, 1 }
  0x4f   : > { %s286_s24 = scalar_lea.vmem [#allocation6], %s1263_s7  ;;  %p747_p8 = scmp.ne.s32.totalorder %s1041_s21, 0 }
  0x50   : > { %s1380_s22 = smov (!%p333_p7, %s1045_s22), 1 }
  0x51   : > { %s760_s8 = sshll.u32 %s1380_s22, 4  ;;  %352 = sbr.rel (%p747_p8) target bundleno = 90 (0x5a), region = 48 }
  0x52   : > { %s1270_s28 = scalar_lea.vmem %s1345_s3, %s760_s8  ;;  %s1275_s10 = scalar_lea.vmem %s1346_s4, %s760_s8 }
  0x53   : > { %s1280_s11 = scalar_lea.vmem %s1347_s5, %s760_s8 }
  0x56   : > { %vm353_vm0 = vcmask 7168   ;;  %v1064_v0 = vmov -1e+30   ;;  %v1065_v1 = vmov 0.0  }
  0x57   : > { %354 = vst.msk [vmem:[%s1270_s28] sm:$0xff] %vm353_vm0, %v1064_v0  ;;  %355 = vst.msk [vmem:[%s1270_s28 + $0x8] sm:$0xff] %vm353_vm0, %v1064_v0 }
  0x58   : > { %356 = vst.msk [vmem:[%s1275_s10] sm:$0xff] %vm353_vm0, %v1065_v1  ;;  %357 = vst.msk [vmem:[%s1275_s10 + $0x8] sm:$0xff] %vm353_vm0, %v1065_v1 }
  0x59   : > { %358 = vst.msk [vmem:[%s1280_s11] sm:$0xff] %vm353_vm0, %v1065_v1  ;;  %359 = vst.msk [vmem:[%s1280_s11 + $0x8] sm:$0xff] %vm353_vm0, %v1065_v1 }
  0x5a PF: > { %v888_v2 = vld [vmem:[%s1257_s30 + $0x38] sm:$0xff]   ;;  %v1066_v3 = vmov 0.0   ;;  %vm1067_vm1 = vmmov 0   ;;  %v889_v4 = vld [vmem:[%s1257_s30 + $0x30] sm:$0xff]   ;;  %v890_v5 = vld [vmem:[%s1257_s30 + $0x28] sm:$0xff]   ;;  %v476_v12 = vlaneseq  ;;  %v1068_v27 = vmov 0  }
  0x5b   : > { %772 = vmatprep.subr.bf16.mxu0 %v1066_v3  ;;  %788 = vmatprep.mubr.msk.bf16.mxu0 %vm1067_vm1, %v1066_v3  ;;  %v891_v6 = vld [vmem:[%s1257_s30 + $0x20] sm:$0xff]   ;;  %v892_v7 = vld [vmem:[%s1257_s30 + $0x18] sm:$0xff]   ;;  %v893_v8 = vld [vmem:[%s1257_s30 + $0x10] sm:$0xff]   ;;  %vm488_vm2 = vcmask 7168  }
  0x5c   : > { %773 = vmatpush3.bf16.xpose.msra.mxu0 %v888_v2  ;;  %v894_v9 = vld [vmem:[%s1257_s30 + $0x8] sm:$0xff]   ;;  %v895_v10 = vld [vmem:[%s1257_s30] sm:$0xff]   ;;  %v896_v11 = vld [vmem:[#allocation2] sm:$0xff]   ;;  %v477_v13 = vshrl.u32 %v476_v12, 7  ;;  %886 = vset.pattern.permute.xlu1 %v1068_v27 }
  0x5d   : > { %774 = vmatprep.subr.bf16.mxu0 %v1066_v3  ;;  %v473_v15 = vld [vmem:[%s286_s24] sm:$0x3]  ;;  %887 = vset.pattern.permute.xlu0 %v1068_v27 }
  0x5e   : > { %v493_v14 = vsub.s32 1, %v477_v13  ;;  %v478_v17 = vsub.s32 0, %v477_v13  ;;  %v497_v28 = vld [vmem:[%s1270_s28] sm:$0xff]  ;;  %v498_v31 = vld [vmem:[%s1270_s28 + $0x8] sm:$0xff] }
  0x5f   : > { %v511_v53 = vld [vmem:[%s1275_s10] sm:$0xff]  ;;  %v512_v57 = vld [vmem:[%s1275_s10 + $0x8] sm:$0xff] }
  0x60   : > { %v494_v16 = vrot.slane %v473_v15, %v493_v14  ;;  %v479_v21 = vrot.slane %v473_v15, %v478_v17  ;;  %v474_v35 = vld [vmem:[%s1280_s11] sm:$0xff]  ;;  %v475_v47 = vld [vmem:[%s1280_s11 + $0x8] sm:$0xff] }
  0x64   : > { %775 = vmatpush3.bf16.xpose.msra.mxu0 %v889_v4 }
  0x65   : > { %776 = vmatprep.subr.bf16.mxu0 %v1066_v3 }
  0x6c   : > { %777 = vmatpush3.bf16.xpose.msra.mxu0 %v890_v5 }
  0x6d   : > { %778 = vmatprep.subr.bf16.mxu0 %v1066_v3 }
  0x74   : > { %779 = vmatpush3.bf16.xpose.msra.mxu0 %v891_v6 }
  0x75   : > { %780 = vmatprep.subr.bf16.mxu0 %v1066_v3 }
  0x7c   : > { %781 = vmatpush3.bf16.xpose.msra.mxu0 %v892_v7 }
  0x7d   : > { %782 = vmatprep.subr.bf16.mxu0 %v1066_v3 }
  0x84   : > { %783 = vmatpush3.bf16.xpose.msra.mxu0 %v893_v8 }
  0x85   : > { %784 = vmatprep.subr.bf16.mxu0 %v1066_v3 }
  0x8c   : > { %785 = vmatpush3.bf16.xpose.msra.mxu0 %v894_v9 }
  0x8d   : > { %786 = vmatprep.subr.bf16.mxu0 %v1066_v3 }
  0x94   : > { %787 = vmatpush3.bf16.xpose.msra.mxu0 %v895_v10 }
  0x9b   : > { %789 = vmatmul.mubr.bf16.vlgmr.msra.gmra.mxu0 %v896_v11 }
 0x15b   : > { %v466_v18 = vpop.f32.mrf.mxu0 }
 0x15c   : > { %v495_v19 = vadd.f32 %v494_v16, %v466_v18  ;;  %v480_v26 = vmul.f32 %v479_v21, %v466_v18 }
 0x15d   : > { %v790_v20 = vpop.f32.mrf.mxu0 }
 0x15e   : > { %499 = vmax.xlane.f32.xlu0 %v495_v19 }
 0x15f   : > { %v469_v22 = vpop.f32.mrf.mxu0 }
 0x160   : > { %v496_v23 = vadd.f32 %v494_v16, %v469_v22  ;;  %v481_v24 = vmul.f32 %v479_v21, %v469_v22 }
 0x161   : > { %v791_v25 = vpop.f32.mrf.mxu0 }
 0x162   : > { %501 = vmax.xlane.f32.xlu0 %v496_v23 }
 0x166   : > { %482 = vadd.xlane.f32.xlu0 %v480_v26 }
 0x1e7   : > { %v500_v29 = vpop.xlane.xlu0 %499 }
 0x1e8   : > { %v503_v30 = vmax.f32 %v497_v28, %v500_v29 }
 0x1ea   : > { %v505_v32 = vsub.f32 %v497_v28, %v503_v30  ;;  %539 = vst.msk [vmem:[%s1270_s28] sm:$0xff] %vm488_vm2, %v503_v30  ;;  %517 = vperm.xlu1 %886, %v503_v30  }
 0x1eb   : > { %v502_v33 = vpop.xlane.xlu0 %501 }
 0x1ec   : > { %v504_v34 = vmax.f32 %v498_v31, %v502_v33  ;;  %v507_v50 = vmul.f32 1.442695, %v505_v32 }
 0x1ee   : > { %v506_v36 = vsub.f32 %v498_v31, %v504_v34  ;;  %540 = vst.msk [vmem:[%s1270_s28 + $0x8] sm:$0xff] %vm488_vm2, %v504_v34  ;;  %522 = vperm.xlu1 %886, %v504_v34  }
 0x1ef   : > { %v483_v37 = vpop.xlane.xlu0 %482 }
 0x1f0   : > { %v486_v38 = vadd.f32 %v483_v37, %v474_v35  ;;  %v509_v51 = vmul.f32 1.442695, %v506_v36 }
 0x1f2   : > { %489 = vst.msk [vmem:[%s1280_s11] sm:$0xff] %vm488_vm2, %v486_v38 }
 0x212   : > { %484 = vadd.xlane.f32.xlu1 %v481_v24 }
 0x265   : > { %v518_v39 = vpop.permute.xlu1 %517 }
 0x266   : > { %v525_v40 = vsub.f32 %v495_v19, %v518_v39 }
 0x268   : > { %v527_v41 = vmul.f32 1.442695, %v525_v40 }
 0x269   : > { %v523_v42 = vpop.permute.xlu1 %522 }
 0x26a   : > { %897 = vpow2.f32 %v527_v41  ;;  %v526_v43 = vsub.f32 %v496_v23, %v523_v42 }
 0x26c   : > { %v529_v44 = vmul.f32 1.442695, %v526_v43 }
 0x26e   : > { %899 = vpow2.f32 %v529_v44 }
 0x26f   : > { %901 = vpow2.f32 %v507_v50 }
 0x270   : > { %903 = vpow2.f32 %v509_v51 }
 0x277   : > { %v898_v45 = vpop.eup %897 }
 0x278   : > { %531 = vadd.xlane.f32.xlu0 %v898_v45 }
 0x27b   : > { %v900_v46 = vpop.eup %899 }
 0x27c   : > { %533 = vadd.xlane.f32.xlu0 %v900_v46  ;;  %v902_v52 = vpop.eup %901 }
 0x27d   : > { %v513_v54 = vmul.f32 %v902_v52, %v511_v53  ;;  %v904_v55 = vpop.eup %903 }
 0x27e   : > { %v514_v59 = vmul.f32 %v904_v55, %v512_v57 }
 0x29b   : > { %v485_v48 = vpop.xlane.xlu1 %484 }
 0x29c   : > { %v487_v49 = vadd.f32 %v485_v48, %v475_v47 }
 0x29e   : > { %490 = vst.msk [vmem:[%s1280_s11 + $0x8] sm:$0xff] %vm488_vm2, %v487_v49 }
 0x301   : > { %v532_v56 = vpop.xlane.xlu0 %531 }
 0x302   : > { %v535_v58 = vadd.f32 %v532_v56, %v513_v54 }
 0x304   : > { %537 = vst.msk [vmem:[%s1275_s10] sm:$0xff] %vm488_vm2, %v535_v58 }
 0x305   : > { %v534_v60 = vpop.xlane.xlu0 %533 }
 0x306   : > { %v536_v61 = vadd.f32 %v534_v60, %v514_v59 }
 0x308   : > { %538 = vst.msk [vmem:[%s1275_s10 + $0x8] sm:$0xff] %vm488_vm2, %v536_v61 }
 0x309 PF: > { %s20_s25 = sadd.s32 1, %s1057_s25   ;;  %s1366_s22 = sld [smem:[#allocation9_spill]] }
 0x30a   : > { %p17_p3 = scmp.ge.s32.totalorder %s20_s25, 6   ;;  %s1367_s24 = sld [smem:[#allocation10_spill]] }
 0x30b   : > { %s1368_s18 = smov %s1033_s19  ;;  %s1369_s19 = smov %s1037_s20 }
 0x30c   : > { %s1370_s20 = smov %s1168_s14  ;;  %s1371_s21 = smov %s1049_s23 }
 0x30d   : > { %s1372_s23 = smov %s1374_s26  ;;  %19 = sbr.rel (!%p17_p3) target bundleno = 6 (0x6), region = 116 }
 0x312   :  { %594 = vsyncpa [#allocation3], 1 }
 0x313   :  { %596 = vsyncpa [#allocation3 + $0x1], 1 }
 0x314   :  { %597 = vsyncpa [#allocation5], 1 }
 0x315   :  { %599 = vsyncpa [#allocation5 + $0x1], 1 }

</bundles_post_ra>
